<compile_context>
chip_gen: v7x
topology: tpu7x:2x2x1
jax: 0.10.0
libtpu: 0.0.40
codegen_flags: <defaults>
</compile_context>

<pallas_src>
import math

import jax
import jax.numpy as jnp
import numpy as np
from jax import lax
from jax.experimental import pallas as pl
from jax.experimental.pallas import tpu as pltpu

_LN_EPS = 1e-6  # the module constructs nn.LayerNorm(d_model, eps=1e-06)


def _round_up(a: int, b: int) -> int:
    return (a + b - 1) // b * b


def _num_tensorcores() -> int:
    """2 for dual-TensorCore chips (v7x-class), else 1."""
    try:
        kind = jax.devices()[0].device_kind.lower()
    except Exception:
        return 1
    return 2 if ("v7" in kind or "7x" in kind) else 1


def _pick_row_tile(rows: int, num_tc: int) -> int:
    """Row tile: multiple of 8, capped at 256, balanced across TensorCores."""
    if rows <= 8:
        return max(rows, 1)
    max_tm = 256
    if num_tc > 1:
        # >= 4 balanced tiles per core so each core can pipeline its x-tile DMAs.
        tm = _round_up(pl.cdiv(rows, 4 * num_tc), 8)
    else:
        # single TC: one big tile when it fits (no per-step overhead for nothing).
        tm = _round_up(rows, 8)
    return max(8, min(tm, max_tm))


def _pick_ff_tile(d_ff_pad: int) -> int:
    """Largest ff chunk in {512,384,256,128} that divides d_ff_pad (no partial
    chunks on the reduction axis — padding garbage would corrupt the accumulator)."""
    for t in (512, 384, 256, 128):
        if d_ff_pad % t == 0:
            return min(t, d_ff_pad)
    return d_ff_pad


def positionwise_feed_forward(x, w1, b1, w2, b2, gamma, beta, *,
                              dropout: float = 0.1, eps: float = _LN_EPS):
    """Pallas TPU equivalent of PositionwiseFeedForward.forward (eval mode).

    Args:
      x:  (batch, seq_len, d_model)
      w1: (d_ff, d_model)  b1: (d_ff,)     -- PyTorch nn.Linear layout (not transposed)
      w2: (d_model, d_ff)  b2: (d_model,)
      gamma, beta: (d_model,)              -- LayerNorm affine params
    Returns:
      (batch, seq_len, d_model)
    """
    B, S, D = x.shape
    d_ff = w1.shape[0]
    rows = B * S
    dtype = x.dtype

    D_pad = _round_up(D, 128)
    d_ff_pad = _round_up(d_ff, 128)
    t_ff = _pick_ff_tile(d_ff_pad)

    # ---- lane-dense padding (zeros; LN stats divide by the true D) ----
    x2d = x.reshape(rows, D)
    if D_pad != D:
        x2d = jnp.pad(x2d, ((0, 0), (0, D_pad - D)))

    w1p = jnp.asarray(w1)
    w2p = jnp.asarray(w2)
    if D_pad != D or d_ff_pad != d_ff:
        w1p = jnp.pad(w1p, ((0, d_ff_pad - d_ff), (0, D_pad - D)))
        w2p = jnp.pad(w2p, ((0, D_pad - D), (0, d_ff_pad - d_ff)))
    b1p = jnp.pad(jnp.asarray(b1).reshape(1, d_ff), ((0, 0), (0, d_ff_pad - d_ff)))
    # gamma padded with 0 => LN output is exactly 0 in padded lanes; beta/b2 pad 0.
    params = jnp.stack([
        jnp.pad(jnp.asarray(gamma), (0, D_pad - D)),
        jnp.pad(jnp.asarray(beta), (0, D_pad - D)),
        jnp.pad(jnp.asarray(b2), (0, D_pad - D)),
    ], axis=0)  # (3, D_pad): gamma / beta / b2 merged into one resident block

    x_it = jnp.dtype(dtype).itemsize
    w_it = jnp.dtype(w1p.dtype).itemsize

    num_tc = _num_tensorcores()
    tm = _pick_row_tile(rows, num_tc)

    def _vmem_estimate(tm_):
        return (4 * tm_ * D_pad * x_it                       # x + out, double-buffered
                + 4 * t_ff * D_pad * w_it                    # W1/W2 chunks, double-buffered
                + 2 * (8 * t_ff + 8 * D_pad) * w_it          # b1 + params (sublane padded)
                + tm_ * D_pad * (x_it + 4))                  # ln + f32 accumulator scratch

    # keep the footprint comfortably under v7x's 64 MiB VMEM
    while tm > 8 and _vmem_estimate(tm) > (48 << 20):
        tm = max(8, _round_up(tm // 2, 8))

    grid = (pl.cdiv(rows, tm), d_ff_pad // t_ff)
    inv_d = 1.0 / float(D)

    def kernel(x_ref, params_ref, w1_ref, b1_ref, w2_ref, out_ref, ln_ref, acc_ref):
        j = pl.program_id(1)

        @pl.when(j == 0)
        def _():
            xf = x_ref[...].astype(jnp.float32)
            # one-pass LayerNorm statistics; padded lanes are zero so the sums are
            # over the true features, divided by the true D.
            s = jnp.sum(xf, axis=-1, keepdims=True)
            sq = jnp.sum(xf * xf, axis=-1, keepdims=True)
            mean = s * inv_d
            var = jnp.maximum(sq * inv_d - mean * mean, 0.0)
            inv = lax.rsqrt(var + eps)
            g = params_ref[0:1, :].astype(jnp.float32)
            bta = params_ref[1:2, :].astype(jnp.float32)
            ln_ref[...] = ((xf - mean) * inv * g + bta).astype(ln_ref.dtype)
            acc_ref[...] = jnp.zeros_like(acc_ref)

        # w_1 chunk (t_ff, D) in PyTorch layout: contract last dims (ln @ W1_chunk^T).
        h = lax.dot_general(ln_ref[...], w1_ref[...],
                            (((1,), (1,)), ((), ())),
                            preferred_element_type=jnp.float32)     # (tm, t_ff) f32
        h = jnp.maximum(h + b1_ref[...].astype(jnp.float32), 0.0)   # ReLU (dropout_1 = id)
        h = h.astype(ln_ref.dtype)       # bf16 MXU path + smaller intermediate for bf16 models
        # w_2 chunk (D, t_ff): contract last dims, accumulate in f32.
        acc_ref[...] += lax.dot_general(h, w2_ref[...],
                                        (((1,), (1,)), ((), ())),
                                        preferred_element_type=jnp.float32)

        @pl.when(j == pl.num_programs(1) - 1)
        def _():
            b2v = params_ref[2:3, :].astype(jnp.float32)
            out_ref[...] = (acc_ref[...] + b2v
                            + x_ref[...].astype(jnp.float32)).astype(out_ref.dtype)

    n_row_tiles = pl.cdiv(rows, tm)
    cost = pl.CostEstimate(
        flops=4 * rows * D_pad * d_ff_pad + 10 * rows * D_pad,
        transcendentals=rows,  # rsqrt per row
        bytes_accessed=(2 * rows * D_pad * x_it
                        + n_row_tiles * 2 * D_pad * d_ff_pad * w_it
                        + (d_ff_pad + 3 * D_pad) * w_it),
    )

    vmem_limit = int(min(max(int(_vmem_estimate(tm) * 1.5) + (4 << 20), 32 << 20), 64 << 20))

    out2d = pl.pallas_call(
        kernel,
        out_shape=jax.ShapeDtypeStruct((rows, D_pad), dtype),
        grid_spec=pltpu.PrefetchScalarGridSpec(
            num_scalar_prefetch=0,
            grid=grid,
            in_specs=[
                pl.BlockSpec((tm, D_pad), lambda i, j: (i, 0)),    # x row tile (resident over j)
                pl.BlockSpec((3, D_pad), lambda i, j: (0, 0)),     # gamma / beta / b2
                pl.BlockSpec((t_ff, D_pad), lambda i, j: (j, 0)),  # W1 chunk (PyTorch layout)
                pl.BlockSpec((1, t_ff), lambda i, j: (0, j)),      # b1 chunk
                pl.BlockSpec((D_pad, t_ff), lambda i, j: (0, j)),  # W2 chunk (PyTorch layout)
            ],
            out_specs=pl.BlockSpec((tm, D_pad), lambda i, j: (i, 0)),
            scratch_shapes=[
                pltpu.VMEM((tm, D_pad), dtype),        # layer-normed row tile
                pltpu.VMEM((tm, D_pad), jnp.float32),  # f32 output accumulator
            ],
        ),
        compiler_params=pltpu.CompilerParams(
            dimension_semantics=("parallel", "arbitrary"),
            vmem_limit_bytes=vmem_limit,
        ),
        cost_estimate=cost,
    )(x2d, params, w1p, b1p, w2p)

    if D_pad != D:
        out2d = out2d[:, :D]
    return out2d.reshape(B, S, D)


def _reference(x, w1, b1, w2, b2, gamma, beta, eps=_LN_EPS):
    """NumPy port of the PyTorch module forward (eval mode)."""
    x = np.asarray(x, dtype=np.float32)
    mean = x.mean(-1, keepdims=True)
    var = ((x - mean) ** 2).mean(-1, keepdims=True)
    ln = (x - mean) / np.sqrt(var + eps) * np.asarray(gamma) + np.asarray(beta)
    h = np.maximum(ln @ np.asarray(w1).T + np.asarray(b1), 0.0)
    y = h @ np.asarray(w2).T + np.asarray(b2)
    return y + x


if __name__ == "__main__":
    key = jax.random.PRNGKey(0)
    batch, seq, d_model, d_ff = 2, 8, 32, 64

    kx, kw1, kb1, kw2, kb2, kg, kb = jax.random.split(key, 7)
    x = jax.random.normal(kx, (batch, seq, d_model), dtype=jnp.float32)
    bound1 = 1.0 / math.sqrt(d_model)
    bound2 = 1.0 / math.sqrt(d_ff)
    w1 = jax.random.uniform(kw1, (d_ff, d_model), jnp.float32, -bound1, bound1)
    b1 = jax.random.uniform(kb1, (d_ff,), jnp.float32, -bound1, bound1)
    w2 = jax.random.uniform(kw2, (d_model, d_ff), jnp.float32, -bound2, bound2)
    b2 = jax.random.uniform(kb2, (d_model,), jnp.float32, -bound2, bound2)
    gamma = 1.0 + 0.1 * jax.random.normal(kg, (d_model,), dtype=jnp.float32)
    beta = 0.1 * jax.random.normal(kb, (d_model,), dtype=jnp.float32)

    out = positionwise_feed_forward(x, w1, b1, w2, b2, gamma, beta, dropout=0.1)
    out = jax.block_until_ready(out)

    ref = _reference(x, w1, b1, w2, b2, gamma, beta)
    np.testing.assert_allclose(np.asarray(out), ref, rtol=2e-5, atol=2e-5)

    print("KERNEL_OK")
</pallas_src>

<mosaic_0001>
module attributes {stable_mosaic.version = 11 : i64} {
  func.func @kernel(%arg0: i32, %arg1: i32, %arg2: memref<16x128xf32, #tpu.memory_space<vmem>>, %arg3: memref<3x128xf32, #tpu.memory_space<vmem>>, %arg4: memref<128x128xf32, #tpu.memory_space<vmem>>, %arg5: memref<1x128xf32, #tpu.memory_space<vmem>>, %arg6: memref<128x128xf32, #tpu.memory_space<vmem>>, %arg7: memref<16x128xf32, #tpu.memory_space<vmem>>, %arg8: memref<16x128xf32, #tpu.memory_space<vmem>>, %arg9: memref<16x128xf32, #tpu.memory_space<vmem>>) attributes {dimension_semantics = [#tpu.dimension_semantics<parallel>, #tpu.dimension_semantics<arbitrary>], iteration_bounds = array<i64: 1, 1>, scalar_prefetch = 0 : i64, scratch_operands = 2 : i64, tpu.core_type = #tpu.core_type<tc>, window_params = [{transform_indices = @transform_0, window_bounds = array<i64: 16, 128>}, {pipeline_mode = #tpu.pipeline_mode<synchronous>, transform_indices = @transform_1, window_bounds = array<i64: 3, 128>}, {transform_indices = @transform_2, window_bounds = array<i64: 128, 128>}, {transform_indices = @transform_3, window_bounds = array<i64: 1, 128>}, {transform_indices = @transform_4, window_bounds = array<i64: 128, 128>}, {transform_indices = @transform_5, window_bounds = array<i64: 16, 128>}]} {
    %c0_i32 = arith.constant 0 : i32
    %0 = arith.cmpi eq, %arg1, %c0_i32 : i32
    %1 = arith.extui %0 : i1 to i32
    %c0_i32_0 = arith.constant 0 : i32
    %2 = arith.cmpi ne, %1, %c0_i32_0 : i32
    scf.if %2 {
      %c0_16 = arith.constant 0 : index
      %c0_17 = arith.constant 0 : index
      %19 = vector.load %arg2[%c0_16, %c0_17] : memref<16x128xf32, #tpu.memory_space<vmem>>, vector<16x128xf32>
      %cst_18 = arith.constant dense<0.000000e+00> : vector<16xf32>
      %20 = vector.multi_reduction <add>, %19, %cst_18 [1] : vector<16x128xf32> to vector<16xf32>
      %21 = vector.shape_cast %20 : vector<16xf32> to vector<16x1xf32>
      %22 = arith.mulf %19, %19 : vector<16x128xf32>
      %cst_19 = arith.constant dense<0.000000e+00> : vector<16xf32>
      %23 = vector.multi_reduction <add>, %22, %cst_19 [1] : vector<16x128xf32> to vector<16xf32>
      %24 = vector.shape_cast %23 : vector<16xf32> to vector<16x1xf32>
      %cst_20 = arith.constant 3.125000e-02 : f32
      %25 = vector.broadcast %cst_20 : f32 to vector<16x1xf32>
      %26 = arith.mulf %21, %25 : vector<16x1xf32>
      %cst_21 = arith.constant 3.125000e-02 : f32
      %27 = vector.broadcast %cst_21 : f32 to vector<16x1xf32>
      %28 = arith.mulf %24, %27 : vector<16x1xf32>
      %29 = arith.mulf %26, %26 : vector<16x1xf32>
      %30 = arith.subf %28, %29 : vector<16x1xf32>
      %cst_22 = arith.constant 0.000000e+00 : f32
      %31 = vector.broadcast %cst_22 : f32 to vector<16x1xf32>
      %32 = arith.maximumf %30, %31 : vector<16x1xf32>
      %cst_23 = arith.constant 9.99999997E-7 : f32
      %33 = vector.broadcast %cst_23 : f32 to vector<16x1xf32>
      %34 = arith.addf %32, %33 : vector<16x1xf32>
      %35 = math.rsqrt %34 : vector<16x1xf32>
      %c0_24 = arith.constant 0 : index
      %c0_25 = arith.constant 0 : index
      %36 = vector.load %arg3[%c0_24, %c0_25] : memref<3x128xf32, #tpu.memory_space<vmem>>, vector<1x128xf32>
      %c1 = arith.constant 1 : index
      %c0_26 = arith.constant 0 : index
      %37 = vector.load %arg3[%c1, %c0_26] : memref<3x128xf32, #tpu.memory_space<vmem>>, vector<1x128xf32>
      %38 = vector.broadcast %26 : vector<16x1xf32> to vector<16x128xf32>
      %39 = arith.subf %19, %38 : vector<16x128xf32>
      %40 = vector.broadcast %35 : vector<16x1xf32> to vector<16x128xf32>
      %41 = arith.mulf %39, %40 : vector<16x128xf32>
      %42 = vector.broadcast %36 : vector<1x128xf32> to vector<16x128xf32>
      %43 = arith.mulf %41, %42 : vector<16x128xf32>
      %44 = vector.broadcast %37 : vector<1x128xf32> to vector<16x128xf32>
      %45 = arith.addf %43, %44 : vector<16x128xf32>
      %c0_27 = arith.constant 0 : index
      %c0_28 = arith.constant 0 : index
      %46 = vector.load %arg8[%c0_27, %c0_28] : memref<16x128xf32, #tpu.memory_space<vmem>>, vector<16x128xf32>
      tpu.vector_store %arg8[%c0_27, %c0_28], %45 {strides = array<i32>} : memref<16x128xf32, #tpu.memory_space<vmem>>, vector<16x128xf32>,
      %cst_29 = arith.constant 0.000000e+00 : f32
      %47 = vector.broadcast %cst_29 : f32 to vector<16x128xf32>
      %c0_30 = arith.constant 0 : index
      %c0_31 = arith.constant 0 : index
      %48 = vector.load %arg9[%c0_30, %c0_31] : memref<16x128xf32, #tpu.memory_space<vmem>>, vector<16x128xf32>
      tpu.vector_store %arg9[%c0_30, %c0_31], %47 {strides = array<i32>} : memref<16x128xf32, #tpu.memory_space<vmem>>, vector<16x128xf32>,
    } else {
    }
    %c0 = arith.constant 0 : index
    %c0_1 = arith.constant 0 : index
    %3 = vector.load %arg8[%c0, %c0_1] : memref<16x128xf32, #tpu.memory_space<vmem>>, vector<16x128xf32>
    %c0_2 = arith.constant 0 : index
    %c0_3 = arith.constant 0 : index
    %4 = vector.load %arg4[%c0_2, %c0_3] : memref<128x128xf32, #tpu.memory_space<vmem>>, vector<128x128xf32>
    %cst = arith.constant dense<0.000000e+00> : vector<16x128xf32>
    %5 = tpu.matmul %3, %4, %cst {dimension_numbers = #tpu.dot_dimension_numbers<[1], [1], [0], [0], [0, 0, 1, 0], [], []>} : vector<16x128xf32>, vector<128x128xf32>, vector<16x128xf32> -> vector<16x128xf32>
    %c0_4 = arith.constant 0 : index
    %c0_5 = arith.constant 0 : index
    %6 = vector.load %arg5[%c0_4, %c0_5] : memref<1x128xf32, #tpu.memory_space<vmem>>, vector<1x128xf32>
    %7 = vector.broadcast %6 : vector<1x128xf32> to vector<16x128xf32>
    %8 = arith.addf %5, %7 : vector<16x128xf32>
    %cst_6 = arith.constant 0.000000e+00 : f32
    %9 = vector.broadcast %cst_6 : f32 to vector<16x128xf32>
    %10 = arith.maximumf %8, %9 : vector<16x128xf32>
    %c0_7 = arith.constant 0 : index
    %c0_8 = arith.constant 0 : index
    %11 = vector.load %arg9[%c0_7, %c0_8] : memref<16x128xf32, #tpu.memory_space<vmem>>, vector<16x128xf32>
    %c0_9 = arith.constant 0 : index
    %c0_10 = arith.constant 0 : index
    %12 = vector.load %arg6[%c0_9, %c0_10] : memref<128x128xf32, #tpu.memory_space<vmem>>, vector<128x128xf32>
    %cst_11 = arith.constant dense<0.000000e+00> : vector<16x128xf32>
    %13 = tpu.matmul %10, %12, %cst_11 {dimension_numbers = #tpu.dot_dimension_numbers<[1], [1], [0], [0], [0, 0, 1, 0], [], []>} : vector<16x128xf32>, vector<128x128xf32>, vector<16x128xf32> -> vector<16x128xf32>
    %14 = arith.addf %11, %13 : vector<16x128xf32>
    %c0_12 = arith.constant 0 : index
    %c0_13 = arith.constant 0 : index
    %15 = vector.load %arg9[%c0_12, %c0_13] : memref<16x128xf32, #tpu.memory_space<vmem>>, vector<16x128xf32>
    tpu.vector_store %arg9[%c0_12, %c0_13], %14 {strides = array<i32>} : memref<16x128xf32, #tpu.memory_space<vmem>>, vector<16x128xf32>,
    %c0_i32_14 = arith.constant 0 : i32
    %16 = arith.cmpi eq, %arg1, %c0_i32_14 : i32
    %17 = arith.extui %16 : i1 to i32
    %c0_i32_15 = arith.constant 0 : i32
    %18 = arith.cmpi ne, %17, %c0_i32_15 : i32
    scf.if %18 {
      %c2 = arith.constant 2 : index
      %c0_16 = arith.constant 0 : index
      %19 = vector.load %arg3[%c2, %c0_16] : memref<3x128xf32, #tpu.memory_space<vmem>>, vector<1x128xf32>
      %c0_17 = arith.constant 0 : index
      %c0_18 = arith.constant 0 : index
      %20 = vector.load %arg9[%c0_17, %c0_18] : memref<16x128xf32, #tpu.memory_space<vmem>>, vector<16x128xf32>
      %21 = vector.broadcast %19 : vector<1x128xf32> to vector<16x128xf32>
      %22 = arith.addf %20, %21 : vector<16x128xf32>
      %c0_19 = arith.constant 0 : index
      %c0_20 = arith.constant 0 : index
      %23 = vector.load %arg2[%c0_19, %c0_20] : memref<16x128xf32, #tpu.memory_space<vmem>>, vector<16x128xf32>
      %24 = arith.addf %22, %23 : vector<16x128xf32>
      %c0_21 = arith.constant 0 : index
      %c0_22 = arith.constant 0 : index
      %25 = vector.load %arg7[%c0_21, %c0_22] : memref<16x128xf32, #tpu.memory_space<vmem>>, vector<16x128xf32>
      tpu.vector_store %arg7[%c0_21, %c0_22], %24 {strides = array<i32>} : memref<16x128xf32, #tpu.memory_space<vmem>>, vector<16x128xf32>,
    } else {
    }
    return
  }
  func.func @transform_0(%arg0: i32, %arg1: i32) -> (i32, i32) {
    %c0_i32 = arith.constant 0 : i32
    %c0_i32_0 = arith.constant 0 : i32
    return %arg0, %c0_i32 : i32, i32
  }
  func.func @transform_1(%arg0: i32, %arg1: i32) -> (i32, i32) {
    %c0_i32 = arith.constant 0 : i32
    %c0_i32_0 = arith.constant 0 : i32
    %c0_i32_1 = arith.constant 0 : i32
    return %c0_i32, %c0_i32_0 : i32, i32
  }
  func.func @transform_2(%arg0: i32, %arg1: i32) -> (i32, i32) {
    %c0_i32 = arith.constant 0 : i32
    %c0_i32_0 = arith.constant 0 : i32
    return %arg1, %c0_i32 : i32, i32
  }
  func.func @transform_3(%arg0: i32, %arg1: i32) -> (i32, i32) {
    %c0_i32 = arith.constant 0 : i32
    %c0_i32_0 = arith.constant 0 : i32
    return %c0_i32, %arg1 : i32, i32
  }
  func.func @transform_4(%arg0: i32, %arg1: i32) -> (i32, i32) {
    %c0_i32 = arith.constant 0 : i32
    %c0_i32_0 = arith.constant 0 : i32
    return %c0_i32, %arg1 : i32, i32
  }
  func.func @transform_5(%arg0: i32, %arg1: i32) -> (i32, i32) {
    %c0_i32 = arith.constant 0 : i32
    %c0_i32_0 = arith.constant 0 : i32
    return %arg0, %c0_i32 : i32, i32
  }
}

</mosaic_0001>

<bundles_post_ra>
// kernel: tpu_custom_call.1
= control target key start
LH: loop header
LB: loop body
LE: loop exit
PB: predicated region body
PF: predicated region fallthrough
CT: control target
= control target key end

     0   :  { %10 = vsyncpa [#allocation5], 0  ;;  %s805_s0 = inlined_call_operand.hbm [shape: f32[16,128], index: 0, kind: input, shape index: {}]   ;;  %s806_s1 = inlined_call_operand.hbm [shape: f32[3,128], index: 1, kind: input, shape index: {}]   ;;  %s807_s2 = inlined_call_operand.hbm [shape: f32[128,128], index: 2, kind: input, shape index: {}]   ;;  %s808_s3 = inlined_call_operand.vmem [shape: f32[1,128], index: 3, kind: input, shape index: {}]   ;;  %s809_s4 = inlined_call_operand.hbm [shape: f32[128,128], index: 4, kind: input, shape index: {}]   ;;  %s810_s5 = inlined_call_operand.hbm [shape: f32[16,128], index: 5, kind: output, shape index: {}]  }
   0x1   :  { %11 = vsyncpa [#allocation8], 0 }
   0x2   :  { %12 = vsyncpa [#allocation11], 0 }
   0x3   :  { %13 = vsyncpa [#allocation6], 0  ;;  %s665_s18 = smov [#allocation7]   ;;  %s666_s20 = smov [#allocation4]  }
   0x4   :  { %s32_s19 = sshll.u32 %s665_s18, 4  ;;  %s19_s21 = sshll.u32 %s666_s20, 4  ;;  %s33_s19 = int_to_ptr.vmem [resolvable:$true] %s32_s19  ;;  %s702_s21 = int_to_ptr.vmem [resolvable:$true] %s19_s21 }
   0x5   :  { %s547_s24 = scalar_lea.hbm %s806_s1, 64 }
   0x6   :  { %p548_p0 = scmp.ne.s32.totalorder %s806_s1, %s547_s24  ;;  %p551_p1 = scmp.lt.u32.totalorder %s547_s24, %s806_s1 }
   0x8   :  { %p553_p2 = pnand %p551_p1, %p548_p0 }
   0xa   :  { %556 = shalt.err (!%p553_p2)
}
   0xb   :  { %s557_s29 = scalar_lea.vmem %s33_s19, 64  ;;  %p562_p4 = scmp.lt.s32.totalorder %s33_s19, %s33_s19 }
   0xc   :  { %p558_p3 = scmp.ne.s32.totalorder %s33_s19, %s557_s29  ;;  %p563_p5 = scmp.lt.s32.totalorder %s557_s29, %s557_s29 }
   0xe   :  { %p564_p6 = por %p563_p5, %p562_p4 }
  0x10   :  { %p565_p7 = pnand %p564_p6, %p558_p3 }
  0x12   :  { %568 = shalt.err (!%p565_p7)
}
  0x13   :  { %35 = dma.hbm_to_vmem [thread:$0]  %s806_s1, 64, %s33_s19, [#allocation8]  }
  0x14   :  { %s569_s9 = scalar_lea.hbm %s805_s0, 256 }
  0x15   :  { %p570_p8 = scmp.ne.s32.totalorder %s805_s0, %s569_s9  ;;  %p573_p9 = scmp.lt.u32.totalorder %s569_s9, %s805_s0 }
  0x17   :  { %p575_p10 = pnand %p573_p9, %p570_p8 }
  0x19   :  { %578 = shalt.err (!%p575_p10)
}
  0x1a   :  { %s579_s14 = scalar_lea.vmem %s702_s21, 256  ;;  %p584_p12 = scmp.lt.s32.totalorder %s702_s21, %s702_s21 }
  0x1b   :  { %p580_p11 = scmp.ne.s32.totalorder %s702_s21, %s579_s14  ;;  %p585_p13 = scmp.lt.s32.totalorder %s579_s14, %s579_s14 }
  0x1d   :  { %p586_p0 = por %p585_p13, %p584_p12 }
  0x1f   :  { %p587_p1 = pnand %p586_p0, %p580_p11 }
  0x21   :  { %590 = shalt.err (!%p587_p1)
}
  0x22   :  { %s667_s1 = smov 128   ;;  %s668_s15 = smov 8  }
  0x23   :  { %25 = dma.hbm_to_vmem [thread:$0]  %s805_s0, 256, %s702_s21, [#allocation5], %s667_s1, %s667_s1, %s668_s15  }
  0x24   :  { %s669_s18 = smov [#allocation9]   ;;  %s670_s20 = smov [#allocation10]  }
  0x25   :  { %s41_s19 = sshll.u32 %s669_s18, 4  ;;  %s55_s22 = sshll.u32 %s670_s20, 4  ;;  %s42_s19 = int_to_ptr.vmem [resolvable:$true] %s41_s19  ;;  %s736_s22 = int_to_ptr.vmem [resolvable:$true] %s55_s22 }
  0x26   :  { %s591_s25 = scalar_lea.hbm %s807_s2, 2048 }
  0x27   :  { %p592_p2 = scmp.ne.s32.totalorder %s807_s2, %s591_s25  ;;  %p595_p3 = scmp.lt.u32.totalorder %s591_s25, %s807_s2 }
  0x29   :  { %p597_p4 = pnand %p595_p3, %p592_p2 }
  0x2b   :  { %600 = shalt.err (!%p597_p4)
}
  0x2c   :  { %s601_s0 = scalar_lea.vmem %s42_s19, 2048  ;;  %p606_p6 = scmp.lt.s32.totalorder %s42_s19, %s42_s19 }
  0x2d   :  { %p602_p5 = scmp.ne.s32.totalorder %s42_s19, %s601_s0  ;;  %p607_p7 = scmp.lt.s32.totalorder %s601_s0, %s601_s0 }
  0x2f   :  { %p608_p8 = por %p607_p7, %p606_p6 }
  0x31   :  { %p609_p9 = pnand %p608_p8, %p602_p5 }
  0x33   :  { %612 = shalt.err (!%p609_p9)
}
  0x34   :  { %47 = dma.hbm_to_vmem [thread:$0]  %s807_s2, 2048, %s42_s19, [#allocation8], %s667_s1, %s667_s1, %s668_s15  }
  0x35   :  { %s613_s8 = scalar_lea.hbm %s809_s4, 2048 }
  0x36   :  { %p614_p10 = scmp.ne.s32.totalorder %s809_s4, %s613_s8  ;;  %p617_p11 = scmp.lt.u32.totalorder %s613_s8, %s809_s4 }
  0x38   :  { %p619_p12 = pnand %p617_p11, %p614_p10 }
  0x3a   :  { %622 = shalt.err (!%p619_p12)
}
  0x3b   :  { %s623_s13 = scalar_lea.vmem %s736_s22, 2048  ;;  %p628_p0 = scmp.lt.s32.totalorder %s736_s22, %s736_s22 }
  0x3c   :  { %p624_p13 = scmp.ne.s32.totalorder %s736_s22, %s623_s13  ;;  %p629_p1 = scmp.lt.s32.totalorder %s623_s13, %s623_s13 }
  0x3e   :  { %p630_p2 = por %p629_p1, %p628_p0 }
  0x40   :  { %p631_p3 = pnand %p630_p2, %p624_p13 }
  0x42   :  { %634 = shalt.err (!%p631_p3)
}
  0x43   :  { %61 = dma.hbm_to_vmem [thread:$0]  %s809_s4, 2048, %s736_s22, [#allocation11], %s667_s1, %s667_s1, %s668_s15  }
  0x44   :  { %657 = dma.done.wait [#allocation5], 256  }
  0x45   :  { %658 = vsyncadd [#allocation5], 4294967040 }
  0x46   :  { %659 = dma.done.wait [#allocation8], 2112  }
  0x47   :  { %660 = vsyncadd [#allocation8], 4294965184 }
  0x48   :  { %661 = dma.done.wait [#allocation11], 2048  }
  0x49   :  { %662 = vsyncadd [#allocation11], 4294965248  ;;  %v773_v0 = vld [vmem:[#allocation4] sm:$0xff]  ;;  %v775_v1 = vld [vmem:[#allocation4 + $0x8] sm:$0xff]  ;;  %s671_s17 = smov [#allocation12]  }
  0x4a   :  { %v128_v2 = vld [vmem:[#allocation9] sm:$0xff]  ;;  %80 = vadd.xlane.f32.xlu0 %v773_v0  ;;  %v84_v3 = vmul.f32 %v773_v0, %v773_v0  ;;  %v129_v4 = vld [vmem:[#allocation9 + $0x8] sm:$0xff]  ;;  %v130_v5 = vld [vmem:[#allocation9 + $0x10] sm:$0xff]  ;;  %v85_v9 = vmul.f32 %v775_v1, %v775_v1  ;;  %s348_s18 = sshll.u32 %s671_s17, 4  ;;  %s349_s18 = int_to_ptr.vmem [resolvable:$true] %s348_s18 }
  0x4b   :  { %v131_v6 = vld [vmem:[#allocation9 + $0x18] sm:$0xff]  ;;  %v472_v7 = vpack.c.bf16 %v129_v4, %v128_v2  ;;  %v132_v10 = vld [vmem:[#allocation9 + $0x20] sm:$0xff]  ;;  %v133_v11 = vld [vmem:[#allocation9 + $0x28] sm:$0xff]  ;;  %p640_p5 = scmp.lt.s32.totalorder %s349_s18, %s349_s18 }
  0x4c   :  { %v476_v8 = vpack.c.bf16 %v131_v6, %v130_v5  ;;  %86 = vadd.xlane.f32.xlu1 %v84_v3  ;;  %v480_v12 = vpack.c.bf16 %v133_v11, %v132_v10  ;;  %v134_v13 = vld [vmem:[#allocation9 + $0x30] sm:$0xff]  ;;  %v135_v14 = vld [vmem:[#allocation9 + $0x38] sm:$0xff]  ;;  %v136_v16 = vld [vmem:[#allocation9 + $0x40] sm:$0xff] }
  0x4d   :  { %473 = vmatprep.subr.bf16.mxu0 %v472_v7  ;;  %v484_v15 = vpack.c.bf16 %v135_v14, %v134_v13  ;;  %v137_v17 = vld [vmem:[#allocation9 + $0x48] sm:$0xff]  ;;  %v138_v19 = vld [vmem:[#allocation9 + $0x50] sm:$0xff]  ;;  %v139_v20 = vld [vmem:[#allocation9 + $0x58] sm:$0xff] }
  0x4e   :  { %82 = vadd.xlane.f32.xlu0 %v775_v1  ;;  %475 = vmatpush3.bf16.xpose.msra.mxu0 %v472_v7  ;;  %v488_v18 = vpack.c.bf16 %v137_v17, %v136_v16  ;;  %v492_v21 = vpack.c.bf16 %v139_v20, %v138_v19  ;;  %v140_v22 = vld [vmem:[#allocation9 + $0x60] sm:$0xff]  ;;  %v141_v23 = vld [vmem:[#allocation9 + $0x68] sm:$0xff]  ;;  %v232_v27 = vld [vmem:[#allocation10 + $0x10] sm:$0xff] }
  0x4f   :  { %477 = vmatprep.subr.bf16.mxu0 %v476_v8  ;;  %v496_v24 = vpack.c.bf16 %v141_v23, %v140_v22  ;;  %v230_v25 = vld [vmem:[#allocation10] sm:$0xff]  ;;  %v231_v26 = vld [vmem:[#allocation10 + $0x8] sm:$0xff]  ;;  %v142_v28 = vld [vmem:[#allocation9 + $0x70] sm:$0xff] }
  0x50   :  { %88 = vadd.xlane.f32.xlu1 %v85_v9  ;;  %v143_v29 = vld [vmem:[#allocation9 + $0x78] sm:$0xff]  ;;  %v504_v30 = vpack.c.bf16 %v231_v26, %v230_v25  ;;  %v234_v34 = vld [vmem:[#allocation10 + $0x20] sm:$0xff]  ;;  %v235_v35 = vld [vmem:[#allocation10 + $0x28] sm:$0xff] }
  0x51   :  { %v233_v31 = vld [vmem:[#allocation10 + $0x18] sm:$0xff]  ;;  %v500_v33 = vpack.c.bf16 %v143_v29, %v142_v28  ;;  %v512_v36 = vpack.c.bf16 %v235_v35, %v234_v34  ;;  %v236_v37 = vld [vmem:[#allocation10 + $0x30] sm:$0xff]  ;;  %v238_v40 = vld [vmem:[#allocation10 + $0x40] sm:$0xff] }
  0x52   :  { %v508_v32 = vpack.c.bf16 %v233_v31, %v232_v27  ;;  %505 = vmatprep.subr.bf16.mxu1 %v504_v30  ;;  %v237_v38 = vld [vmem:[#allocation10 + $0x38] sm:$0xff]  ;;  %v239_v41 = vld [vmem:[#allocation10 + $0x48] sm:$0xff]  ;;  %v240_v43 = vld [vmem:[#allocation10 + $0x50] sm:$0xff] }
  0x53   :  { %507 = vmatpush3.bf16.xpose.msra.mxu1 %v504_v30  ;;  %v516_v39 = vpack.c.bf16 %v237_v38, %v236_v37  ;;  %v520_v42 = vpack.c.bf16 %v239_v41, %v238_v40  ;;  %v241_v44 = vld [vmem:[#allocation10 + $0x58] sm:$0xff]  ;;  %v242_v46 = vld [vmem:[#allocation10 + $0x60] sm:$0xff]  ;;  %v243_v47 = vld [vmem:[#allocation10 + $0x68] sm:$0xff] }
  0x54   :  { %509 = vmatprep.subr.bf16.mxu1 %v508_v32  ;;  %v524_v45 = vpack.c.bf16 %v241_v44, %v240_v43  ;;  %v528_v48 = vpack.c.bf16 %v243_v47, %v242_v46  ;;  %v244_v49 = vld [vmem:[#allocation10 + $0x70] sm:$0xff]  ;;  %v245_v50 = vld [vmem:[#allocation10 + $0x78] sm:$0xff] }
  0x55   :  { %v532_v51 = vpack.c.bf16 %v245_v50, %v244_v49  ;;  %v363_v10 = vld [vmem:[#allocation7 + $0x1] ss:$0 sm:$0xff]  ;;  %v365_v25 = vld [vmem:[#allocation7 + $0x2] ss:$0 sm:$0xff] }
  0x56   :  { %479 = vmatpush3.bf16.xpose.msra.mxu0 %v476_v8  ;;  %v362_v8 = vld [vmem:[#allocation7] ss:$0 sm:$0xff] }
  0x57   :  { %481 = vmatprep.subr.bf16.mxu0 %v480_v12 }
  0x5b   :  { %511 = vmatpush3.bf16.xpose.msra.mxu1 %v508_v32 }
  0x5c   :  { %513 = vmatprep.subr.bf16.mxu1 %v512_v36 }
  0x5e   :  { %483 = vmatpush3.bf16.xpose.msra.mxu0 %v480_v12 }
  0x5f   :  { %485 = vmatprep.subr.bf16.mxu0 %v484_v15 }
  0x63   :  { %515 = vmatpush3.bf16.xpose.msra.mxu1 %v512_v36 }
  0x64   :  { %517 = vmatprep.subr.bf16.mxu1 %v516_v39 }
  0x66   :  { %487 = vmatpush3.bf16.xpose.msra.mxu0 %v484_v15 }
  0x67   :  { %489 = vmatprep.subr.bf16.mxu0 %v488_v18 }
  0x6b   :  { %519 = vmatpush3.bf16.xpose.msra.mxu1 %v516_v39 }
  0x6c   :  { %521 = vmatprep.subr.bf16.mxu1 %v520_v42 }
  0x6e   :  { %491 = vmatpush3.bf16.xpose.msra.mxu0 %v488_v18  ;;  %v364_v18 = vld [vmem:[%s808_s3] ss:$0 sm:$0xff]  ;;  %s635_s3 = scalar_lea.vmem %s349_s18, 256 }
  0x6f   :  { %493 = vmatprep.subr.bf16.mxu0 %v492_v21  ;;  %p636_p4 = scmp.ne.s32.totalorder %s349_s18, %s635_s3  ;;  %p641_p6 = scmp.lt.s32.totalorder %s635_s3, %s635_s3 }
  0x71   :  { %p642_p7 = por %p641_p6, %p640_p5 }
  0x73   :  { %523 = vmatpush3.bf16.xpose.msra.mxu1 %v520_v42  ;;  %p643_p8 = pnand %p642_p7, %p636_p4 }
  0x74   :  { %525 = vmatprep.subr.bf16.mxu1 %v524_v45 }
  0x76   :  { %495 = vmatpush3.bf16.xpose.msra.mxu0 %v492_v21 }
  0x77   :  { %497 = vmatprep.subr.bf16.mxu0 %v496_v24 }
  0x7b   :  { %527 = vmatpush3.bf16.xpose.msra.mxu1 %v524_v45 }
  0x7c   :  { %529 = vmatprep.subr.bf16.mxu1 %v528_v48 }
  0x7e   :  { %499 = vmatpush3.bf16.xpose.msra.mxu0 %v496_v24 }
  0x7f   :  { %501 = vmatprep.subr.bf16.mxu0 %v500_v33 }
  0x83   :  { %531 = vmatpush3.bf16.xpose.msra.mxu1 %v528_v48 }
  0x84   :  { %533 = vmatprep.subr.bf16.mxu1 %v532_v51 }
  0x86   :  { %503 = vmatpush3.bf16.xpose.msra.mxu0 %v500_v33 }
  0x8b   :  { %535 = vmatpush3.bf16.xpose.msra.mxu1 %v532_v51 }
  0xd7   :  { %v81_v52 = vpop.xlane.xlu0 %80 }
  0xd8   :  { %v90_v53 = vmul.f32 0.03125, %v81_v52 }
  0xd9   :  { %v87_v54 = vpop.xlane.xlu1 %86 }
  0xda   :  { %v94_v55 = vmul.f32 %v90_v53, %v90_v53  ;;  %v92_v56 = vmul.f32 0.03125, %v87_v54  ;;  %v106_v6 = vsub.f32 %v773_v0, %v90_v53 }
  0xdb   :  { %v83_v57 = vpop.xlane.xlu0 %82 }
  0xdc   :  { %v96_v58 = vsub.f32 %v92_v56, %v94_v55  ;;  %v91_v59 = vmul.f32 0.03125, %v83_v57 }
  0xdd   :  { %v89_v60 = vpop.xlane.xlu1 %88 }
  0xde   :  { %v98_v61 = vmax.f32 %v96_v58, 0.0  ;;  %v95_v62 = vmul.f32 %v91_v59, %v91_v59  ;;  %v93_v63 = vmul.f32 0.03125, %v89_v60  ;;  %v107_v11 = vsub.f32 %v775_v1, %v91_v59 }
  0xe0   :  { %v100_v2 = vadd.f32 1e-06, %v98_v61  ;;  %v97_v3 = vsub.f32 %v93_v63, %v95_v62 }
  0xe2   :  { %543 = vrsqrt.f32 %v100_v2  ;;  %v99_v4 = vmax.f32 %v97_v3, 0.0 }
  0xe4   :  { %v101_v5 = vadd.f32 1e-06, %v99_v4 }
  0xe6   :  { %545 = vrsqrt.f32 %v101_v5 }
  0xec   :  { %v544_v7 = vpop.eup %543 }
  0xed   :  { %v108_v9 = vmul.f32 %v544_v7, %v106_v6 }
  0xef   :  { %v114_v12 = vmul.f32 %v362_v8, %v108_v9 }
  0xf0   :  { %v546_v13 = vpop.eup %545 }
  0xf1   :  { %v109_v14 = vmul.f32 %v546_v13, %v107_v11  ;;  %v120_v15 = vadd.f32 %v363_v10, %v114_v12 }
  0xf3   :  { %v115_v16 = vmul.f32 %v362_v8, %v109_v14  ;;  %434 = vmatprep.mubr.f32.mxu0 %v120_v15 }
  0xf5   :  { %v121_v17 = vadd.f32 %v363_v10, %v115_v16 }
  0xf7   :  { %435 = vmatmul.mubr.f32.vlgmr.msra.gmra.mrb[0].mxu0 %v121_v17 }
 0x1ca   :  { %v436_v19 = vpop.f32.mrb[0].mxu0 }
 0x1cb   :  { %v223_v20 = vadd.f32 %v436_v19, %v364_v18  ;;  %v217_v21 = vpop.f32.mrb[1].mxu0 }
 0x1cc   :  { %v218_v22 = vadd.f32 %v364_v18, %v217_v21 }
 0x1cd   :  { %v227_v24 = vmax.f32 %v223_v20, 0.0 }
 0x1ce   :  { %v226_v23 = vmax.f32 %v218_v22, 0.0 }
 0x1d0   :  { %469 = vmatprep.mubr.f32.mxu1 %v226_v23 }
 0x1d1   :  { %470 = vmatmul.mubr.f32.vlgmr.msra.gmra.mrb[0].mxu1 %v227_v24 }
 0x2a4   :  { %v471_v26 = vpop.f32.mrb[0].mxu1 }
 0x2a5   :  { %v336_v27 = vadd.f32 %v471_v26, %v365_v25  ;;  %v312_v28 = vpop.f32.mrb[1].mxu1 }
 0x2a6   :  { %v335_v29 = vadd.f32 %v365_v25, %v312_v28 }
 0x2a7   :  { %v340_v30 = vadd.f32 %v336_v27, %v775_v1 }
 0x2a8   :  { %v339_v31 = vadd.f32 %v335_v29, %v773_v0 }
 0x2a9   :  { %342 = vst [vmem:[#allocation12 + $0x8] sm:$0xff] %v340_v30 }
 0x2aa   :  { %341 = vst [vmem:[#allocation12] sm:$0xff] %v339_v31 }
 0x2ab   :  { %646 = shalt.err (!%p643_p8)
}
 0x2ac   :  { %s647_s22 = scalar_lea.hbm %s810_s5, 256 }
 0x2ad   :  { %p648_p9 = scmp.ne.s32.totalorder %s810_s5, %s647_s22  ;;  %p651_p10 = scmp.lt.u32.totalorder %s647_s22, %s810_s5 }
 0x2af   :  { %p653_p11 = pnand %p651_p10, %p648_p9 }
 0x2b1   :  { %656 = shalt.err (!%p653_p11)
}
 0x2b2   :  { %354 = dma.vmem_to_hbm [thread:$0]  %s349_s18, 256, %s810_s5, [#allocation6], %s667_s1, %s667_s1, %s668_s15  }
 0x2b3   :  { %663 = dma.done.wait [#allocation6], 256  }
 0x2b4   :  { %664 = vsyncadd [#allocation6], 4294967040 }
 0x2b5   :  { %358 = vsyncpa [#allocation5], 1 }
 0x2b6   :  { %359 = vsyncpa [#allocation8], 1 }
 0x2b7   :  { %360 = vsyncpa [#allocation11], 1 }
 0x2b8   :  { %361 = vsyncpa [#allocation6], 1 }

</bundles_post_ra>
